<compile_context>
chip_gen: v7x
topology: tpu7x:2x2x1
jax: 0.10.0
libtpu: 0.0.40
codegen_flags: <defaults>
</compile_context>

<pallas_src>
import functools
import math

import jax
import jax.numpy as jnp
from jax.experimental import pallas as pl
from jax.experimental.pallas import tpu as pltpu

_VMEM_LIMIT = 48 * 1024 * 1024          # <= v7x 64 MiB physical VMEM
_MM_PARAMS = pltpu.CompilerParams(
    dimension_semantics=("parallel", "parallel", "arbitrary"),
    vmem_limit_bytes=_VMEM_LIMIT)
_ONE_PARAMS = pltpu.CompilerParams(
    dimension_semantics=("arbitrary",),
    vmem_limit_bytes=_VMEM_LIMIT)

_TM, _TN, _TK = 256, 512, 512           # matmul tile caps


# ---------------------------------------------------------------------------
# In-kernel activation helpers (f32 math; exp/reciprocal go to the EUP)
# ---------------------------------------------------------------------------

def _sigmoid(x):
    # numerically-stable logistic; EUP exp + approx reciprocal (VALU stays free)
    z = jnp.exp(-jnp.abs(x))
    r = pl.reciprocal(1.0 + z, approx=True)
    return jnp.where(x >= 0, r, z * r)


def _apply_act(x, act):
    if act == "swish":
        return x * _sigmoid(x)
    if act == "sigmoid":
        return _sigmoid(x)
    return x


# ---------------------------------------------------------------------------
# Tiled, fused matmul: act(a @ b + bias) (+ skip)
# ---------------------------------------------------------------------------

def _matmul_kernel(a_ref, b_ref, bias_ref, *rest, act, has_skip):
    if has_skip:
        skip_ref, o_ref, acc_ref = rest
    else:
        skip_ref = None
        o_ref, acc_ref = rest
    k = pl.program_id(2)

    @pl.when(k == 0)
    def _():
        acc_ref[...] = jnp.zeros_like(acc_ref)

    acc_ref[...] += jnp.dot(a_ref[...], b_ref[...],
                            preferred_element_type=jnp.float32)

    @pl.when(k == pl.num_programs(2) - 1)
    def _():
        y = acc_ref[...] + bias_ref[...]
        y = _apply_act(y, act)
        if skip_ref is not None:
            y = y + skip_ref[...].astype(jnp.float32)
        o_ref[...] = y.astype(o_ref.dtype)


def _round_up(x, m):
    return (x + m - 1) // m * m


def _pick(dim, cap):
    if dim <= cap:
        return dim, dim
    return cap, _round_up(dim, cap)


def pallas_matmul_fused(a, b, bias, act="none", skip=None, out_dtype=jnp.bfloat16):
    """out = act(a @ b + bias) (+ skip).  bf16 MXU operands, f32 accumulation."""
    M, K = a.shape
    K2, N = b.shape
    assert K == K2
    tm, Mp = _pick(M, _TM)
    tn, Np = _pick(N, _TN)
    tk, Kp = _pick(K, _TK)

    a = a.astype(jnp.bfloat16)
    b = b.astype(jnp.bfloat16)
    if (Mp, Kp) != (M, K):
        a = jnp.pad(a, ((0, Mp - M), (0, Kp - K)))
    if (Kp, Np) != (K, N):
        b = jnp.pad(b, ((0, Kp - K), (0, Np - N)))
    bias2 = bias.reshape(1, N).astype(jnp.float32)
    if Np != N:
        bias2 = jnp.pad(bias2, ((0, 0), (0, Np - N)))

    operands = [a, b, bias2]
    in_specs = [
        pl.BlockSpec((tm, tk), lambda i, j, k: (i, k)),
        pl.BlockSpec((tk, tn), lambda i, j, k: (k, j)),
        pl.BlockSpec((1, tn), lambda i, j, k: (0, j)),
    ]
    has_skip = skip is not None
    if has_skip:
        sk = skip.astype(jnp.bfloat16)
        if (Mp, Np) != (M, N):
            sk = jnp.pad(sk, ((0, Mp - M), (0, Np - N)))
        operands.append(sk)
        in_specs.append(pl.BlockSpec((tm, tn), lambda i, j, k: (i, j)))

    kern = functools.partial(_matmul_kernel, act=act, has_skip=has_skip)
    out = pl.pallas_call(
        kern,
        out_shape=jax.ShapeDtypeStruct((Mp, Np), out_dtype),
        grid=(Mp // tm, Np // tn, Kp // tk),
        in_specs=in_specs,
        out_specs=pl.BlockSpec((tm, tn), lambda i, j, k: (i, j)),
        scratch_shapes=[pltpu.VMEM((tm, tn), jnp.float32)],
        compiler_params=_MM_PARAMS,
    )(*operands)
    if (Mp, Np) != (M, N):
        out = out[:M, :N]
    return out


# ---------------------------------------------------------------------------
# Depthwise conv: in-kernel tap accumulation (no HBM im2col) + BN bias + swish
# ---------------------------------------------------------------------------

def _dw_kernel(x_ref, w_ref, b_ref, o_ref, *, k, s, Ho, Wo):
    # x_ref: (s*s, N, Hph, Wph, C) stride-phase decomposition of the padded input
    acc = None
    for di in range(k):
        for dj in range(k):
            p = (di % s) * s + (dj % s)
            oi, oj = di // s, dj // s
            tap = x_ref[p, :, oi:oi + Ho, oj:oj + Wo, :].astype(jnp.float32)
            contrib = tap * w_ref[di * k + dj]          # (1, C) broadcast
            acc = contrib if acc is None else acc + contrib
    y = acc + b_ref[...]
    y = y * _sigmoid(y)                                 # fused swish
    o_ref[...] = y.astype(o_ref.dtype)


def _same_pad(x, k, s):
    N, H, W, C = x.shape

    def amt(size):
        out = -(-size // s)
        pad = max((out - 1) * s + k - size, 0)
        return pad // 2, pad - pad // 2

    return jnp.pad(x, ((0, 0), amt(H), amt(W), (0, 0)))


def depthwise_bn_swish(x, w, b, k, s, out_dtype=jnp.bfloat16):
    # w: (k, k, C) with BN folded in; b: (C,)
    N, H, W, C = x.shape
    xp = _same_pad(x, k, s)
    Hp, Wp = xp.shape[1], xp.shape[2]
    Ho = (Hp - k) // s + 1
    Wo = (Wp - k) // s + 1
    Hph = Ho + (k - 1) // s
    Wph = Wo + (k - 1) // s
    # pad so every stride phase has uniform (Hph, Wph) extent (extra zeros unread)
    xp = jnp.pad(xp, ((0, 0), (0, Hph * s - Hp), (0, Wph * s - Wp), (0, 0)))
    phases = xp.reshape(N, Hph, s, Wph, s, C)
    phases = jnp.transpose(phases, (2, 4, 0, 1, 3, 5))
    phases = phases.reshape(s * s, N, Hph, Wph, C).astype(jnp.bfloat16)

    kern = functools.partial(_dw_kernel, k=k, s=s, Ho=Ho, Wo=Wo)
    return pl.pallas_call(
        kern,
        out_shape=jax.ShapeDtypeStruct((N, Ho, Wo, C), out_dtype),
        grid=(1,),
        in_specs=[
            pl.BlockSpec((s * s, N, Hph, Wph, C), lambda i: (0, 0, 0, 0, 0)),
            pl.BlockSpec((k * k, 1, C), lambda i: (0, 0, 0)),
            pl.BlockSpec((1, C), lambda i: (0, 0)),
        ],
        out_specs=pl.BlockSpec((N, Ho, Wo, C), lambda i: (0, 0, 0, 0)),
        compiler_params=_ONE_PARAMS,
    )(phases, w.reshape(k * k, 1, C).astype(jnp.float32),
      b.reshape(1, C).astype(jnp.float32))


# ---------------------------------------------------------------------------
# Fused squeeze-and-excitation: pool -> reduce -> swish -> expand -> sigmoid -> scale
# ---------------------------------------------------------------------------

def _se_kernel(x_ref, wr_ref, br_ref, wx_ref, bx_ref, o_ref, *, inv_hw):
    x = x_ref[...].astype(jnp.float32)                           # (B, HW, C)
    pooled = jnp.sum(x, axis=1) * inv_hw                         # (B, C)
    s = jnp.dot(pooled.astype(jnp.bfloat16), wr_ref[...],
                preferred_element_type=jnp.float32) + br_ref[...]
    s = s * _sigmoid(s)                                          # swish
    s = jnp.dot(s.astype(jnp.bfloat16), wx_ref[...],
                preferred_element_type=jnp.float32) + bx_ref[...]
    s = _sigmoid(s)                                              # (B, C)
    o_ref[...] = (x * s.reshape(s.shape[0], 1, s.shape[1])).astype(o_ref.dtype)


def pallas_se_block(x3, reduce_params, expand_params, out_dtype=jnp.bfloat16):
    B, HW, C = x3.shape
    wr, br = reduce_params
    wx, bx = expand_params
    S = wr.shape[1]
    kern = functools.partial(_se_kernel, inv_hw=1.0 / HW)
    return pl.pallas_call(
        kern,
        out_shape=jax.ShapeDtypeStruct((B, HW, C), out_dtype),
        grid=(1,),
        in_specs=[
            pl.BlockSpec((B, HW, C), lambda i: (0, 0, 0)),
            pl.BlockSpec((C, S), lambda i: (0, 0)),
            pl.BlockSpec((1, S), lambda i: (0, 0)),
            pl.BlockSpec((S, C), lambda i: (0, 0)),
            pl.BlockSpec((1, C), lambda i: (0, 0)),
        ],
        out_specs=pl.BlockSpec((B, HW, C), lambda i: (0, 0, 0)),
        compiler_params=_ONE_PARAMS,
    )(x3.astype(jnp.bfloat16), wr.astype(jnp.bfloat16),
      br.reshape(1, S).astype(jnp.float32),
      wx.astype(jnp.bfloat16), bx.reshape(1, C).astype(jnp.float32))


# ---------------------------------------------------------------------------
# Fused network tail: global avg pool -> fc(1792,1000) -> Linear(1000,2)
# ---------------------------------------------------------------------------

def _tail_kernel(x_ref, wf_ref, bf_ref, wo_ref, bo_ref, o_ref, *, inv_hw):
    x = x_ref[...].astype(jnp.float32)                           # (B, HW, C)
    pooled = jnp.sum(x, axis=1) * inv_hw                         # (B, C)
    feats = jnp.dot(pooled.astype(jnp.bfloat16), wf_ref[...],
                    preferred_element_type=jnp.float32) + bf_ref[...]
    logits = jnp.dot(feats.astype(jnp.bfloat16), wo_ref[...],
                     preferred_element_type=jnp.float32) + bo_ref[...]
    o_ref[...] = logits.astype(o_ref.dtype)


def pallas_head_tail(x3, fc_params, out_params):
    B, HW, C = x3.shape
    wf, bf = fc_params
    wo, bo = out_params
    F1, F2 = wf.shape[1], wo.shape[1]
    kern = functools.partial(_tail_kernel, inv_hw=1.0 / HW)
    return pl.pallas_call(
        kern,
        out_shape=jax.ShapeDtypeStruct((B, F2), jnp.float32),
        grid=(1,),
        in_specs=[
            pl.BlockSpec((B, HW, C), lambda i: (0, 0, 0)),
            pl.BlockSpec((C, F1), lambda i: (0, 0)),
            pl.BlockSpec((1, F1), lambda i: (0, 0)),
            pl.BlockSpec((F1, F2), lambda i: (0, 0)),
            pl.BlockSpec((1, F2), lambda i: (0, 0)),
        ],
        out_specs=pl.BlockSpec((B, F2), lambda i: (0, 0)),
        compiler_params=_ONE_PARAMS,
    )(x3.astype(jnp.bfloat16), wf.astype(jnp.bfloat16),
      bf.reshape(1, F1).astype(jnp.float32),
      wo.astype(jnp.bfloat16), bo.reshape(1, F2).astype(jnp.float32))


# ---------------------------------------------------------------------------
# Conv wrappers (1x1 convs -> fused matmul; stem 3x3 via im2col with Cin=1)
# ---------------------------------------------------------------------------

def _extract_patches(x, k, s):
    N, H, W, C = x.shape
    Ho = (H - k) // s + 1
    Wo = (W - k) // s + 1
    taps = []
    for di in range(k):
        for dj in range(k):
            taps.append(x[:, di:di + (Ho - 1) * s + 1:s,
                          dj:dj + (Wo - 1) * s + 1:s, :])
    return jnp.stack(taps, axis=0)


def conv2d_bn_act(x, w, b, k, s, act, out_dtype=jnp.bfloat16):
    # w: (k, k, Cin, Cout) with BN folded in; b: (Cout,)
    N, H, W, Cin = x.shape
    Cout = w.shape[-1]
    if k == 1 and s == 1:
        y = pallas_matmul_fused(x.reshape(N * H * W, Cin), w.reshape(Cin, Cout),
                                b, act=act, out_dtype=out_dtype)
        return y.reshape(N, H, W, Cout)
    xp = _same_pad(x, k, s)
    patches = _extract_patches(xp, k, s)                  # (KK, N, Ho, Wo, Cin)
    KK, _, Ho, Wo, _ = patches.shape
    a = jnp.transpose(patches, (1, 2, 3, 0, 4)).reshape(N * Ho * Wo, KK * Cin)
    y = pallas_matmul_fused(a, w.reshape(KK * Cin, Cout), b, act=act,
                            out_dtype=out_dtype)
    return y.reshape(N, Ho, Wo, Cout)


# ---------------------------------------------------------------------------
# Parameters (deterministic synthetic init; BN folded at setup time)
# ---------------------------------------------------------------------------

# EfficientNet-B4 scaled block args: (kernel, stride, expand, in_ch, out_ch, repeats)
BLOCK_ARGS = [
    (3, 1, 1, 48, 24, 2),
    (3, 2, 6, 24, 32, 4),
    (5, 2, 6, 32, 56, 4),
    (3, 2, 6, 56, 112, 6),
    (5, 1, 6, 112, 160, 6),
    (5, 2, 6, 160, 272, 8),
    (3, 1, 6, 272, 448, 2),
]
STEM_CH = 48
HEAD_CH = 1792


def _conv_bn_params(key, kh, kw, cin, cout, depthwise=False):
    k1, k2, k3, k4, k5 = jax.random.split(key, 5)
    fan_in = kh * kw * (1 if depthwise else cin)
    shape = (kh, kw, cout) if depthwise else (kh, kw, cin, cout)
    w = jax.random.normal(k1, shape, jnp.float32) / math.sqrt(fan_in)
    gamma = 1.0 + 0.1 * jax.random.normal(k2, (cout,), jnp.float32)
    beta = 0.1 * jax.random.normal(k3, (cout,), jnp.float32)
    mean = 0.1 * jax.random.normal(k4, (cout,), jnp.float32)
    var = 1.0 + 0.1 * jnp.abs(jax.random.normal(k5, (cout,), jnp.float32))
    scale = gamma / jnp.sqrt(var + 1e-3)            # EfficientNet BN eps = 1e-3
    return w * scale, beta - mean * scale


def _linear_params(key, cin, cout):
    k1, k2 = jax.random.split(key)
    w = jax.random.normal(k1, (cin, cout), jnp.float32) / math.sqrt(cin)
    b = 0.1 * jax.random.normal(k2, (cout,), jnp.float32)
    return w, b


def build_params(key):
    keys = iter(jax.random.split(key, 256))
    params = {"stem": _conv_bn_params(next(keys), 3, 3, 1, STEM_CH)}
    blocks = []
    for (k, s, e, cin, cout, reps) in BLOCK_ARGS:
        for rep in range(reps):
            inp = cin if rep == 0 else cout
            stride = s if rep == 0 else 1
            mid = inp * e
            sq = max(1, int(inp * 0.25))
            bp = {"cfg": (k, stride, e, inp, cout)}
            if e != 1:
                bp["expand"] = _conv_bn_params(next(keys), 1, 1, inp, mid)
            bp["dw"] = _conv_bn_params(next(keys), k, k, mid, mid, depthwise=True)
            bp["se_reduce"] = _linear_params(next(keys), mid, sq)
            bp["se_expand"] = _linear_params(next(keys), sq, mid)
            bp["project"] = _conv_bn_params(next(keys), 1, 1, mid, cout)
            blocks.append(bp)
    params["blocks"] = blocks
    params["head"] = _conv_bn_params(next(keys), 1, 1, BLOCK_ARGS[-1][4], HEAD_CH)
    params["fc"] = _linear_params(next(keys), HEAD_CH, 1000)
    params["out"] = _linear_params(next(keys), 1000, 2)
    return params


# ---------------------------------------------------------------------------
# Forward pass (EfficientNet-B4 backbone -> fc(1792,1000) -> Linear(1000,2))
# ---------------------------------------------------------------------------

def forward(params, x_nchw):
    x = jnp.transpose(x_nchw, (0, 2, 3, 1)).astype(jnp.bfloat16)   # NCHW -> NHWC

    # Stem: conv 3x3 s2 -> BN -> swish
    w, b = params["stem"]
    x = conv2d_bn_act(x, w, b, k=3, s=2, act="swish")

    # MBConv blocks
    for bp in params["blocks"]:
        k, stride, e, inp, cout = bp["cfg"]
        inputs = x
        if e != 1:
            we, be = bp["expand"]
            x = conv2d_bn_act(x, we, be, k=1, s=1, act="swish")
        wd, bd = bp["dw"]
        x = depthwise_bn_swish(x, wd, bd, k=k, s=stride)

        # Fused squeeze-and-excitation (pool + 2 matmuls + scale in one kernel)
        N, H, W, C = x.shape
        x3 = pallas_se_block(x.reshape(N, H * W, C),
                             bp["se_reduce"], bp["se_expand"])

        # Projection 1x1 conv with residual add fused in the epilogue
        # (drop_connect is identity in eval mode)
        skip = None
        if stride == 1 and inp == cout:
            skip = inputs.reshape(N * H * W, cout)
        wp, bpj = bp["project"]
        y = pallas_matmul_fused(x3.reshape(N * H * W, C), wp.reshape(C, cout),
                                bpj, act="none", skip=skip)
        x = y.reshape(N, H, W, cout)

    # Head: conv 1x1 -> BN -> swish, then fused pool -> (dropout) -> fc -> Linear(1000,2)
    wh, bh = params["head"]
    x = conv2d_bn_act(x, wh, bh, k=1, s=1, act="swish")
    N, H, W, C = x.shape
    return pallas_head_tail(x.reshape(N, H * W, C), params["fc"], params["out"])


if __name__ == "__main__":
    key = jax.random.PRNGKey(0)
    pkey, xkey = jax.random.split(key)
    params = build_params(pkey)
    # Small input consistent with the module: batch=2, in_channels=1, 32x32 (NCHW)
    x = jax.random.normal(xkey, (2, 1, 32, 32), jnp.float32)
    out = forward(params, x)
    out = jax.block_until_ready(out)
    assert out.shape == (2, 2) and out.dtype == jnp.float32
    print("KERNEL_OK")
</pallas_src>

<mosaic_0001>
module attributes {stable_mosaic.version = 11 : i64} {
  func.func @_matmul_kernel(%arg0: i32, %arg1: i32, %arg2: i32, %arg3: memref<256x9xbf16, #tpu.memory_space<vmem>>, %arg4: memref<9x48xbf16, #tpu.memory_space<vmem>>, %arg5: memref<1x48xf32, #tpu.memory_space<vmem>>, %arg6: memref<256x48xbf16, #tpu.memory_space<vmem>>, %arg7: memref<256x48xf32, #tpu.memory_space<vmem>>) attributes {dimension_semantics = [#tpu.dimension_semantics<parallel>, #tpu.dimension_semantics<parallel>, #tpu.dimension_semantics<arbitrary>], iteration_bounds = array<i64: 2, 1, 1>, scalar_prefetch = 0 : i64, scratch_operands = 1 : i64, tpu.core_type = #tpu.core_type<tc>, window_params = [{transform_indices = @transform_0, window_bounds = array<i64: 256, 9>}, {transform_indices = @transform_1, window_bounds = array<i64: 9, 48>}, {transform_indices = @transform_2, window_bounds = array<i64: 1, 48>}, {transform_indices = @transform_3, window_bounds = array<i64: 256, 48>}]} {
    %c0_i32 = arith.constant 0 : i32
    %0 = arith.cmpi eq, %arg2, %c0_i32 : i32
    %1 = arith.extui %0 : i1 to i32
    %c0_i32_0 = arith.constant 0 : i32
    %2 = arith.cmpi ne, %1, %c0_i32_0 : i32
    scf.if %2 {
      %cst_10 = arith.constant 0.000000e+00 : f32
      %12 = vector.broadcast %cst_10 : f32 to vector<256x48xf32>
      %c0_11 = arith.constant 0 : index
      %c0_12 = arith.constant 0 : index
      %13 = vector.load %arg7[%c0_11, %c0_12] : memref<256x48xf32, #tpu.memory_space<vmem>>, vector<256x48xf32>
      tpu.vector_store %arg7[%c0_11, %c0_12], %12 {strides = array<i32>} : memref<256x48xf32, #tpu.memory_space<vmem>>, vector<256x48xf32>,
    } else {
    }
    %c0 = arith.constant 0 : index
    %c0_1 = arith.constant 0 : index
    %3 = vector.load %arg7[%c0, %c0_1] : memref<256x48xf32, #tpu.memory_space<vmem>>, vector<256x48xf32>
    %c0_2 = arith.constant 0 : index
    %c0_3 = arith.constant 0 : index
    %4 = vector.load %arg3[%c0_2, %c0_3] : memref<256x9xbf16, #tpu.memory_space<vmem>>, vector<256x9xbf16>
    %c0_4 = arith.constant 0 : index
    %c0_5 = arith.constant 0 : index
    %5 = vector.load %arg4[%c0_4, %c0_5] : memref<9x48xbf16, #tpu.memory_space<vmem>>, vector<9x48xbf16>
    %cst = arith.constant dense<0.000000e+00> : vector<256x48xf32>
    %6 = tpu.matmul %4, %5, %cst {dimension_numbers = #tpu.dot_dimension_numbers<[1], [0], [0], [1], [0, 0, 1, 1], [], []>} : vector<256x9xbf16>, vector<9x48xbf16>, vector<256x48xf32> -> vector<256x48xf32>
    %7 = arith.addf %3, %6 : vector<256x48xf32>
    %c0_6 = arith.constant 0 : index
    %c0_7 = arith.constant 0 : index
    %8 = vector.load %arg7[%c0_6, %c0_7] : memref<256x48xf32, #tpu.memory_space<vmem>>, vector<256x48xf32>
    tpu.vector_store %arg7[%c0_6, %c0_7], %7 {strides = array<i32>} : memref<256x48xf32, #tpu.memory_space<vmem>>, vector<256x48xf32>,
    %c0_i32_8 = arith.constant 0 : i32
    %9 = arith.cmpi eq, %arg2, %c0_i32_8 : i32
    %10 = arith.extui %9 : i1 to i32
    %c0_i32_9 = arith.constant 0 : i32
    %11 = arith.cmpi ne, %10, %c0_i32_9 : i32
    scf.if %11 {
      %c0_10 = arith.constant 0 : index
      %c0_11 = arith.constant 0 : index
      %12 = vector.load %arg7[%c0_10, %c0_11] : memref<256x48xf32, #tpu.memory_space<vmem>>, vector<256x48xf32>
      %c0_12 = arith.constant 0 : index
      %c0_13 = arith.constant 0 : index
      %13 = vector.load %arg5[%c0_12, %c0_13] : memref<1x48xf32, #tpu.memory_space<vmem>>, vector<1x48xf32>
      %14 = vector.broadcast %13 : vector<1x48xf32> to vector<256x48xf32>
      %15 = arith.addf %12, %14 : vector<256x48xf32>
      %16 = math.absf %15 : vector<256x48xf32>
      %cst_14 = arith.constant 0.000000e+00 : f32
      %17 = vector.broadcast %cst_14 : f32 to vector<256x48xf32>
      %18 = arith.subf %17, %16 : vector<256x48xf32>
      %19 = math.exp %18 : vector<256x48xf32>
      %cst_15 = arith.constant 1.000000e+00 : f32
      %20 = vector.broadcast %cst_15 : f32 to vector<256x48xf32>
      %21 = arith.addf %20, %19 : vector<256x48xf32>
      %22 = tpu.reciprocal %21 {approx = true} : vector<256x48xf32> -> vector<256x48xf32>
      %cst_16 = arith.constant 0.000000e+00 : f32
      %23 = vector.broadcast %cst_16 : f32 to vector<256x48xf32>
      %24 = arith.cmpf oge, %15, %23 : vector<256x48xf32>
      %25 = arith.mulf %19, %22 : vector<256x48xf32>
      %26 = arith.select %24, %22, %25 : vector<256x48xi1>, vector<256x48xf32>
      %27 = arith.mulf %15, %26 : vector<256x48xf32>
      %28 = arith.truncf %27 : vector<256x48xf32> to vector<256x48xbf16>
      %c0_17 = arith.constant 0 : index
      %c0_18 = arith.constant 0 : index
      %29 = vector.load %arg6[%c0_17, %c0_18] : memref<256x48xbf16, #tpu.memory_space<vmem>>, vector<256x48xbf16>
      tpu.vector_store %arg6[%c0_17, %c0_18], %28 {strides = array<i32>} : memref<256x48xbf16, #tpu.memory_space<vmem>>, vector<256x48xbf16>,
    } else {
    }
    return
  }
  func.func @transform_0(%arg0: i32, %arg1: i32, %arg2: i32) -> (i32, i32) {
    %c0_i32 = arith.constant 0 : i32
    return %arg0, %arg2 : i32, i32
  }
  func.func @transform_1(%arg0: i32, %arg1: i32, %arg2: i32) -> (i32, i32) {
    %c0_i32 = arith.constant 0 : i32
    return %arg2, %arg1 : i32, i32
  }
  func.func @transform_2(%arg0: i32, %arg1: i32, %arg2: i32) -> (i32, i32) {
    %c0_i32 = arith.constant 0 : i32
    %c0_i32_0 = arith.constant 0 : i32
    return %c0_i32, %arg1 : i32, i32
  }
  func.func @transform_3(%arg0: i32, %arg1: i32, %arg2: i32) -> (i32, i32) {
    %c0_i32 = arith.constant 0 : i32
    return %arg0, %arg1 : i32, i32
  }
}

</mosaic_0001>

<bundles_post_ra>
// kernel: tpu_custom_call.1
= control target key start
LH: loop header
LB: loop body
LE: loop exit
PB: predicated region body
PF: predicated region fallthrough
CT: control target
= control target key end

     0   :  { %s1777_s12 = smov 0   ;;  %s1779_s13 = smov 0   ;;  %s2386_s0 = inlined_call_operand.vmem [shape: bf16[512,9], index: 0, kind: input, shape index: {}]   ;;  %s2387_s1 = inlined_call_operand.vmem [shape: bf16[9,48], index: 1, kind: input, shape index: {}]   ;;  %s2388_s2 = inlined_call_operand.vmem [shape: f32[1,48], index: 2, kind: input, shape index: {}]   ;;  %s2389_s3 = inlined_call_operand.vmem [shape: bf16[512,48], index: 3, kind: output, shape index: {}]  }
   0x1   :  { %s1781_s14 = smov 0  }
   0x2 LB: > { %s32_s15 = sadd.s32 1, %s1749_s13  ;;  %p1402_p0 = scmp.ge.s32.totalorder %s1753_s14, 1  ;;  %s1753_s14 = sphi %s1781_s14, %s13_s14   ;;  %s1749_s13 = sphi %s1779_s13, %s2392_s13   ;;  %s1745_s12 = sphi %s1777_s12, %s2391_s12  }
   0x3   : > { %p34_p1 = scmp.ge.s32.totalorder %s32_s15, 2  ;;  %p188_p2 = scmp.lt.s32.totalorder %s1753_s14, 3 }
   0x5   : > { %s2394_s15 = smov (%p34_p1, %s32_s15), 0  ;;  %p189_p3 = pnand %p1402_p0, %p188_p2 }
   0x6   : > { %v1586_v0 = vld [vmem:[%s2387_s1] sm:$0x1f] (!%p189_p3)   ;;  %vm497_vm0 = vcmask (!%p189_p3), 1043456   ;;  %vm498_vm1 = vcmask (!%p189_p3), 1044480   ;;  %s1403_s18 = sshll.u32 (!%p189_p3), %s1745_s12, 5  ;;  %v1755_v1 = vmov (!%p189_p3), 65535  }
   0x7   : > { %192 = sbr.rel (%p189_p3) target bundleno = 365 (0x16d), region = 32  ;;  %v499_v2 = vsel (!%p189_p3), %vm497_vm0, 4294967295, %v1755_v1  ;;  %p1803_p4 = scmp.lt.s32.totalorder (!%p189_p3), %s1403_s18, 63  ;;  %vm264_vm2 = vcmask (!%p189_p3), 392192   ;;  %v1756_v4 = vmov (!%p189_p3), 0.0   ;;  %vm448_vm3 = vcmask (!%p189_p3), 72704  }
   0x8   : > { %v500_v3 = vsel (!%p189_p3), %vm498_vm1, %v499_v2, 0  ;;  %267 = vst.msk [vmem:[#allocation2 + $0x10] sm:$0xff] (!%p189_p3), %vm264_vm2, %v1756_v4  ;;  %265 = vst.msk [vmem:[#allocation2] sm:$0xff] (!%p189_p3), %vm264_vm2, %v1756_v4  ;;  %v1896_v49 = vld [vmem:[%s2388_s2] ss:$0 sm:$0xff] (!%p189_p3)  ;;  %vm1252_vm7 = vcmask (!%p189_p3), 388096  }
   0x9   : > { %266 = vst.msk [vmem:[#allocation2 + $0x8] sm:$0xff] (!%p189_p3), %vm264_vm2, %v1756_v4  ;;  %268 = vst.msk [vmem:[#allocation2 + $0x18] sm:$0xff] (!%p189_p3), %vm264_vm2, %v1756_v4  ;;  %v502_v5 = vand.u32 (!%p189_p3), %v1586_v0, %v500_v3 }
   0xa   : > { %269 = vst.msk [vmem:[#allocation2 + $0x20] sm:$0xff] (!%p189_p3), %vm264_vm2, %v1756_v4  ;;  %270 = vst.msk [vmem:[#allocation2 + $0x28] sm:$0xff] (!%p189_p3), %vm264_vm2, %v1756_v4 }
   0xb   : > { %271 = vst.msk [vmem:[#allocation2 + $0x30] sm:$0xff] (!%p189_p3), %vm264_vm2, %v1756_v4  ;;  %272 = vst.msk [vmem:[#allocation2 + $0x38] sm:$0xff] (!%p189_p3), %vm264_vm2, %v1756_v4  ;;  %1524 = vmatprep.subr.bf16.mxu0 (!%p189_p3), %v502_v5  ;;  %1558 = vmatprep.subr.bf16.mxu1 (!%p189_p3), %v502_v5 }
   0xc   : > { %273 = vst.msk [vmem:[#allocation2 + $0x40] sm:$0xff] (!%p189_p3), %vm264_vm2, %v1756_v4  ;;  %274 = vst.msk [vmem:[#allocation2 + $0x48] sm:$0xff] (!%p189_p3), %vm264_vm2, %v1756_v4  ;;  %1525 = vmatpush3.bf16.msra.mxu0 (!%p189_p3), %v502_v5  ;;  %1559 = vmatpush3.bf16.msra.mxu1 (!%p189_p3), %v502_v5 }
   0xd   : > { %275 = vst.msk [vmem:[#allocation2 + $0x50] sm:$0xff] (!%p189_p3), %vm264_vm2, %v1756_v4  ;;  %276 = vst.msk [vmem:[#allocation2 + $0x58] sm:$0xff] (!%p189_p3), %vm264_vm2, %v1756_v4 }
   0xe   : > { %277 = vst.msk [vmem:[#allocation2 + $0x60] sm:$0xff] %vm264_vm2, %v1756_v4  ;;  %278 = vst.msk [vmem:[#allocation2 + $0x68] sm:$0xff] %vm264_vm2, %v1756_v4  ;;  %s2396_s18 = smov (!%p1803_p4, %s1403_s18), 63 }
   0xf   : > { %279 = vst.msk [vmem:[#allocation2 + $0x70] sm:$0xff] %vm264_vm2, %v1756_v4  ;;  %280 = vst.msk [vmem:[#allocation2 + $0x78] sm:$0xff] %vm264_vm2, %v1756_v4  ;;  %s1404_s20 = sshll.u32 %s2396_s18, 2  ;;  %v299_v22 = vld [vmem:[#allocation2 + $0x10] sm:$0xff]  ;;  %v297_v24 = vld [vmem:[#allocation2] sm:$0xff] }
  0x10   : > { %281 = vst.msk [vmem:[#allocation2 + $0x80] sm:$0xff] %vm264_vm2, %v1756_v4  ;;  %282 = vst.msk [vmem:[#allocation2 + $0x88] sm:$0xff] %vm264_vm2, %v1756_v4  ;;  %s1851_s23 = scalar_lea.vmem %s2386_s0, %s1404_s20  ;;  %v300_v27 = vld [vmem:[#allocation2 + $0x18] sm:$0xff]  ;;  %v298_v32 = vld [vmem:[#allocation2 + $0x8] sm:$0xff]  ;;  %s2098_s28 = scalar_lea.vmem %s2389_s3, %s1404_s20 }
  0x11   : > { %283 = vst.msk [vmem:[#allocation2 + $0x90] sm:$0xff] %vm264_vm2, %v1756_v4  ;;  %284 = vst.msk [vmem:[#allocation2 + $0x98] sm:$0xff] %vm264_vm2, %v1756_v4  ;;  %v1587_v6 = vld [vmem:[%s1851_s23] sm:$0xff]   ;;  %v1589_v8 = vld [vmem:[%s1851_s23 + $0x8] sm:$0xff]  }
  0x12   : > { %285 = vst.msk [vmem:[#allocation2 + $0xa0] sm:$0xff] %vm264_vm2, %v1756_v4  ;;  %286 = vst.msk [vmem:[#allocation2 + $0xa8] sm:$0xff] %vm264_vm2, %v1756_v4  ;;  %v1588_v7 = vld [vmem:[%s1851_s23 + $0x40] sm:$0xff]   ;;  %1526 = vmatprep.mubr.msk.bf16.mxu0 %vm448_vm3, %v1587_v6  ;;  %v1590_v9 = vld [vmem:[%s1851_s23 + $0x48] sm:$0xff]  }
  0x13   : > { %287 = vst.msk [vmem:[#allocation2 + $0xb0] sm:$0xff] %vm264_vm2, %v1756_v4  ;;  %288 = vst.msk [vmem:[#allocation2 + $0xb8] sm:$0xff] %vm264_vm2, %v1756_v4  ;;  %1542 = vmatprep.mubr.msk.bf16.mxu1 %vm448_vm3, %v1588_v7  ;;  %1527 = vmatmul.mubr.msk.bf16.vlgmr.msra.gmra.mrb[0].mxu0 %vm448_vm3, %v1589_v8  ;;  %v1591_v10 = vld [vmem:[%s1851_s23 + $0x10] sm:$0xff]   ;;  %v1593_v12 = vld [vmem:[%s1851_s23 + $0x18] sm:$0xff]  }
  0x14   : > { %289 = vst.msk [vmem:[#allocation2 + $0xc0] sm:$0xff] %vm264_vm2, %v1756_v4  ;;  %290 = vst.msk [vmem:[#allocation2 + $0xc8] sm:$0xff] %vm264_vm2, %v1756_v4  ;;  %1543 = vmatmul.mubr.msk.bf16.vlgmr.msra.gmra.mrb[0].mxu1 %vm448_vm3, %v1590_v9  ;;  %v1592_v11 = vld [vmem:[%s1851_s23 + $0x50] sm:$0xff]   ;;  %1530 = vmatprep.mubr.msk.bf16.mxu0 %vm448_vm3, %v1591_v10  ;;  %v1594_v13 = vld [vmem:[%s1851_s23 + $0x58] sm:$0xff]  }
  0x15   : > { %291 = vst.msk [vmem:[#allocation2 + $0xd0] sm:$0xff] %vm264_vm2, %v1756_v4  ;;  %292 = vst.msk [vmem:[#allocation2 + $0xd8] sm:$0xff] %vm264_vm2, %v1756_v4  ;;  %1546 = vmatprep.mubr.msk.bf16.mxu1 %vm448_vm3, %v1592_v11  ;;  %v1595_v14 = vld [vmem:[%s1851_s23 + $0x20] sm:$0xff]   ;;  %v1597_v16 = vld [vmem:[%s1851_s23 + $0x28] sm:$0xff]  }
  0x16   : > { %293 = vst.msk [vmem:[#allocation2 + $0xe0] sm:$0xff] %vm264_vm2, %v1756_v4  ;;  %294 = vst.msk [vmem:[#allocation2 + $0xe8] sm:$0xff] %vm264_vm2, %v1756_v4  ;;  %v1596_v15 = vld [vmem:[%s1851_s23 + $0x60] sm:$0xff]   ;;  %v1598_v17 = vld [vmem:[%s1851_s23 + $0x68] sm:$0xff]  }
  0x17   : > { %295 = vst.msk [vmem:[#allocation2 + $0xf0] sm:$0xff] %vm264_vm2, %v1756_v4  ;;  %296 = vst.msk [vmem:[#allocation2 + $0xf8] sm:$0xff] %vm264_vm2, %v1756_v4  ;;  %v1599_v18 = vld [vmem:[%s1851_s23 + $0x30] sm:$0xff]   ;;  %v1601_v20 = vld [vmem:[%s1851_s23 + $0x38] sm:$0xff]  }
  0x18   : > { %v1600_v19 = vld [vmem:[%s1851_s23 + $0x70] sm:$0xff]   ;;  %v1602_v21 = vld [vmem:[%s1851_s23 + $0x78] sm:$0xff]   ;;  %v313_v26 = vld [vmem:[#allocation2 + $0x80] sm:$0xff] }
  0x19   : > { %v315_v23 = vld [vmem:[#allocation2 + $0x90] sm:$0xff]  ;;  %v316_v31 = vld [vmem:[#allocation2 + $0x98] sm:$0xff]  ;;  %v314_v37 = vld [vmem:[#allocation2 + $0x88] sm:$0xff] }
  0x1a   : > { %v303_v46 = vld [vmem:[#allocation2 + $0x30] sm:$0xff]  ;;  %v301_v48 = vld [vmem:[#allocation2 + $0x20] sm:$0xff]  ;;  %v304_v52 = vld [vmem:[#allocation2 + $0x38] sm:$0xff] }
  0x1b   : > { %1531 = vmatmul.mubr.msk.bf16.gmra.mrb[4].mxu0 %vm448_vm3, %v1593_v12  ;;  %v319_v47 = vld [vmem:[#allocation2 + $0xb0] sm:$0xff]  ;;  %v317_v51 = vld [vmem:[#allocation2 + $0xa0] sm:$0xff]  ;;  %v320_v56 = vld [vmem:[#allocation2 + $0xb8] sm:$0xff] }
  0x1c   : > { %1547 = vmatmul.mubr.msk.bf16.gmra.mrb[4].mxu1 %vm448_vm3, %v1594_v13  ;;  %1534 = vmatprep.mubr.msk.bf16.mxu0 %vm448_vm3, %v1595_v14  ;;  %v302_v57 = vld [vmem:[#allocation2 + $0x28] sm:$0xff] }
  0x1d   : > { %1550 = vmatprep.mubr.msk.bf16.mxu1 %vm448_vm3, %v1596_v15 }
  0x23   : > { %1535 = vmatmul.mubr.msk.bf16.gmra.mrb[8].mxu0 %vm448_vm3, %v1597_v16 }
  0x24   : > { %1551 = vmatmul.mubr.msk.bf16.gmra.mrb[8].mxu1 %vm448_vm3, %v1598_v17  ;;  %1538 = vmatprep.mubr.msk.bf16.mxu0 %vm448_vm3, %v1599_v18 }
  0x25   : > { %1554 = vmatprep.mubr.msk.bf16.mxu1 %vm448_vm3, %v1600_v19 }
  0x2b   : > { %1539 = vmatmul.mubr.msk.bf16.gmra.mrb[12].mxu0 %vm448_vm3, %v1601_v20 }
  0x2c   : > { %1555 = vmatmul.mubr.msk.bf16.gmra.mrb[12].mxu1 %vm448_vm3, %v1602_v21 }
  0xe6   : > { %v1528_v25 = vpop.f32.mrb[0].mxu0 }
  0xe7   : > { %v667_v28 = vadd.f32 %v1528_v25, %v299_v22  ;;  %v1544_v29 = vpop.f32.mrb[0].mxu1  ;;  %v538_v30 = vpop.f32.mrb[1].mxu0 }
  0xe8   : > { %v683_v33 = vadd.f32 %v1544_v29, %v315_v23  ;;  %v665_v34 = vadd.f32 %v538_v30, %v297_v24  ;;  %v602_v35 = vpop.f32.mrb[1].mxu1  ;;  %v1529_v36 = vpop.f32.mrb[2].mxu0 }
  0xe9   : > { %700 = vst.msk [vmem:[#allocation2 + $0x10] sm:$0xff] %vm264_vm2, %v667_v28  ;;  %v681_v38 = vadd.f32 %v602_v35, %v313_v26  ;;  %v668_v39 = vadd.f32 %v1529_v36, %v300_v27  ;;  %v1545_v40 = vpop.f32.mrb[2].mxu1  ;;  %v541_v41 = vpop.f32.mrb[3].mxu0 }
  0xea   : > { %716 = vst.msk [vmem:[#allocation2 + $0x90] sm:$0xff] %vm264_vm2, %v683_v33  ;;  %698 = vst.msk [vmem:[#allocation2] sm:$0xff] %vm264_vm2, %v665_v34  ;;  %v684_v42 = vadd.f32 %v1545_v40, %v316_v31  ;;  %v666_v43 = vadd.f32 %v541_v41, %v298_v32  ;;  %v605_v44 = vpop.f32.mrb[3].mxu1 }
  0xeb   : > { %714 = vst.msk [vmem:[#allocation2 + $0x80] sm:$0xff] %vm264_vm2, %v681_v38  ;;  %701 = vst.msk [vmem:[#allocation2 + $0x18] sm:$0xff] %vm264_vm2, %v668_v39  ;;  %v682_v45 = vadd.f32 %v605_v44, %v314_v37 }
  0xec   : > { %717 = vst.msk [vmem:[#allocation2 + $0x98] sm:$0xff] %vm264_vm2, %v684_v42  ;;  %699 = vst.msk [vmem:[#allocation2 + $0x8] sm:$0xff] %vm264_vm2, %v666_v43 }
  0xed   : > { %715 = vst.msk [vmem:[#allocation2 + $0x88] sm:$0xff] %vm264_vm2, %v682_v45 }
  0xee   : > { %v1532_v50 = vpop.f32.mrb[4].mxu0 }
  0xef   : > { %v671_v53 = vadd.f32 %v1532_v50, %v303_v46  ;;  %v1548_v54 = vpop.f32.mrb[4].mxu1  ;;  %v554_v55 = vpop.f32.mrb[5].mxu0 }
  0xf0   : > { %v735_v58 = vld [vmem:[#allocation2 + $0x10] sm:$0xff]  ;;  %v687_v59 = vadd.f32 %v1548_v54, %v319_v47  ;;  %v669_v60 = vadd.f32 %v554_v55, %v301_v48  ;;  %v618_v61 = vpop.f32.mrb[5].mxu1  ;;  %v1533_v62 = vpop.f32.mrb[6].mxu0 }
  0xf1   : > { %v1899_v63 = vadd.f32 %v1896_v49, %v735_v58  ;;  %v751_v0 = vld [vmem:[#allocation2 + $0x90] sm:$0xff]  ;;  %v733_v1 = vld [vmem:[#allocation2] sm:$0xff]  ;;  %704 = vst.msk [vmem:[#allocation2 + $0x30] sm:$0xff] %vm264_vm2, %v671_v53  ;;  %v685_v2 = vadd.f32 %v618_v61, %v317_v51  ;;  %v672_v3 = vadd.f32 %v1533_v62, %v304_v52  ;;  %v1549_v4 = vpop.f32.mrb[6].mxu1  ;;  %v557_v5 = vpop.f32.mrb[7].mxu0 }
  0xf2   : > { %v1903_v6 = vadd.f32 %v1896_v49, %v751_v0  ;;  %v1906_v7 = vadd.f32 %v1896_v49, %v733_v1  ;;  %v749_v8 = vld [vmem:[#allocation2 + $0x80] sm:$0xff]  ;;  %v736_v9 = vld [vmem:[#allocation2 + $0x18] sm:$0xff]  ;;  %720 = vst.msk [vmem:[#allocation2 + $0xb0] sm:$0xff] %vm264_vm2, %v687_v59  ;;  %702 = vst.msk [vmem:[#allocation2 + $0x20] sm:$0xff] %vm264_vm2, %v669_v60  ;;  %v688_v10 = vadd.f32 %v1549_v4, %v320_v56  ;;  %v1910_v12 = vpop.f32.mrb[7].mxu1 }
  0xf3   : > { %v670_v11 = vadd.f32 %v557_v5, %v302_v57  ;;  %v806_v13 = vand.u32 2147483647, %v1899_v63  ;;  %v1914_v14 = vadd.f32 %v1896_v49, %v749_v8  ;;  %v1917_v15 = vadd.f32 %v1896_v49, %v736_v9  ;;  %v752_v16 = vld [vmem:[#allocation2 + $0x98] sm:$0xff]  ;;  %718 = vst.msk [vmem:[#allocation2 + $0xa0] sm:$0xff] %vm264_vm2, %v685_v2  ;;  %705 = vst.msk [vmem:[#allocation2 + $0x38] sm:$0xff] %vm264_vm2, %v672_v3  ;;  %v734_v19 = vld [vmem:[#allocation2 + $0x8] sm:$0xff] }
  0xf4   : > { %v822_v17 = vand.u32 2147483647, %v1903_v6  ;;  %v804_v18 = vand.u32 2147483647, %v1906_v7  ;;  %721 = vst.msk [vmem:[#allocation2 + $0xb8] sm:$0xff] %vm264_vm2, %v688_v10  ;;  %v1928_v25 = vadd.f32 %v1896_v49, %v752_v16  ;;  %v750_v26 = vld [vmem:[#allocation2 + $0x88] sm:$0xff]  ;;  %v1933_v31 = vadd.f32 %v1896_v49, %v734_v19 }
  0xf5   : > { %703 = vst.msk [vmem:[#allocation2 + $0x28] sm:$0xff] %vm264_vm2, %v670_v11  ;;  %v838_v20 = vsub.f32 0.0, %v806_v13  ;;  %v820_v21 = vand.u32 2147483647, %v1914_v14  ;;  %v807_v22 = vand.u32 2147483647, %v1917_v15  ;;  %v1941_v37 = vadd.f32 %v1896_v49, %v750_v26 }
  0xf6   : > { %v854_v23 = vsub.f32 0.0, %v822_v17  ;;  %v836_v24 = vsub.f32 0.0, %v804_v18  ;;  %v1930_v27 = vpop.f32.mrb[8].mxu0  ;;  %v823_v36 = vand.u32 2147483647, %v1928_v25  ;;  %vm998_vm4 = vcmp.ge.f32.partialorder %v1899_v63, 0.0 }
  0xf7   : > { %v872_v28 = vmul.f32 1.442695, %v838_v20  ;;  %v852_v29 = vsub.f32 0.0, %v820_v21  ;;  %v839_v30 = vsub.f32 0.0, %v807_v22  ;;  %v1935_v32 = vpop.f32.mrb[8].mxu1  ;;  %v1937_v33 = vpop.f32.mrb[9].mxu0 }
  0xf8   : > { %v904_v34 = vmul.f32 1.442695, %v854_v23  ;;  %v868_v35 = vmul.f32 1.442695, %v836_v24  ;;  %v739_v40 = vld [vmem:[#allocation2 + $0x30] sm:$0xff]  ;;  %v855_v41 = vsub.f32 0.0, %v823_v36 }
  0xf9   : > { %1603 = vpow2.f32 %v872_v28  ;;  %v900_v38 = vmul.f32 1.442695, %v852_v29  ;;  %v874_v39 = vmul.f32 1.442695, %v839_v30  ;;  %v805_v42 = vand.u32 2147483647, %v1933_v31 }
  0xfa   : > { %1605 = vpow2.f32 %v904_v34  ;;  %v755_v43 = vld [vmem:[#allocation2 + $0xb0] sm:$0xff]  ;;  %v821_v44 = vand.u32 2147483647, %v1941_v37  ;;  %v1946_v45 = vadd.f32 %v1896_v49, %v739_v40  ;;  %v737_v46 = vld [vmem:[#allocation2 + $0x20] sm:$0xff]  ;;  %v906_v48 = vmul.f32 1.442695, %v855_v41 }
  0xfb   : > { %1607 = vpow2.f32 %v868_v35  ;;  %v753_v47 = vld [vmem:[#allocation2 + $0xa0] sm:$0xff]  ;;  %v837_v50 = vsub.f32 0.0, %v805_v42  ;;  %v1949_v51 = vadd.f32 %v1896_v49, %v755_v43  ;;  %v740_v52 = vld [vmem:[#allocation2 + $0x38] sm:$0xff]  ;;  %v1951_v53 = vpop.f32.mrb[9].mxu1  ;;  %v1953_v54 = vpop.f32.mrb[10].mxu0  ;;  %v1964_v2 = vadd.f32 %v1896_v49, %v737_v46  ;;  %v318_v42 = vld [vmem:[#allocation2 + $0xa8] sm:$0xff] }
  0xfc   : > { %1609 = vpow2.f32 %v900_v38  ;;  %v853_v55 = vsub.f32 0.0, %v821_v44  ;;  %v810_v56 = vand.u32 2147483647, %v1946_v45  ;;  %v756_v57 = vld [vmem:[#allocation2 + $0xb8] sm:$0xff]  ;;  %v1956_v58 = vpop.f32.mrb[10].mxu1  ;;  %v1958_v59 = vpop.f32.mrb[11].mxu0  ;;  %v1967_v3 = vadd.f32 %v1896_v49, %v753_v47 }
  0xfd   : > { %1611 = vpow2.f32 %v874_v39  ;;  %v870_v60 = vmul.f32 1.442695, %v837_v50  ;;  %v826_v61 = vand.u32 2147483647, %v1949_v51  ;;  %v1961_v62 = vpop.f32.mrb[11].mxu1  ;;  %v1974_v9 = vadd.f32 %v1896_v49, %v740_v52  ;;  %v738_v21 = vld [vmem:[#allocation2 + $0x28] sm:$0xff] }
  0xfe   : > { %1613 = vpow2.f32 %v906_v48  ;;  %v902_v0 = vmul.f32 1.442695, %v853_v55  ;;  %v842_v1 = vsub.f32 0.0, %v810_v56  ;;  %v1969_v4 = vpop.f32.mrb[12].mxu0  ;;  %v1977_v10 = vadd.f32 %v1896_v49, %v756_v57  ;;  %v307_v48 = vld [vmem:[#allocation2 + $0x50] sm:$0xff]  ;;  %v305_v52 = vld [vmem:[#allocation2 + $0x40] sm:$0xff] }
  0xff   : > { %v1971_v5 = vpop.f32.mrb[12].mxu1  ;;  %1615 = vpow2.f32 %v870_v60  ;;  %v858_v8 = vsub.f32 0.0, %v826_v61  ;;  %v1979_v11 = vpop.f32.mrb[13].mxu0  ;;  %v808_v17 = vand.u32 2147483647, %v1964_v2  ;;  %v2007_v47 = vadd.f32 %v1896_v49, %v738_v21  ;;  %v323_v50 = vld [vmem:[#allocation2 + $0xd0] sm:$0xff] }
 0x100   : > { %v1981_v13 = vpop.f32.mrb[13].mxu1  ;;  %1617 = vpow2.f32 %v902_v0  ;;  %v880_v16 = vmul.f32 1.442695, %v842_v1  ;;  %v1984_v18 = vpop.f32.mrb[14].mxu0  ;;  %v824_v20 = vand.u32 2147483647, %v1967_v3  ;;  %v675_v21 = vadd.f32 %v1930_v27, %v307_v48 }
 0x101   : > { %v912_v19 = vmul.f32 1.442695, %v858_v8  ;;  %v840_v23 = vsub.f32 0.0, %v808_v17  ;;  %v811_v24 = vand.u32 2147483647, %v1974_v9  ;;  %v1991_v28 = vpop.f32.mrb[14].mxu1 }
 0x102   : > { %1619 = vpow2.f32 %v880_v16  ;;  %v827_v26 = vand.u32 2147483647, %v1977_v10  ;;  %v856_v34 = vsub.f32 0.0, %v824_v20  ;;  %v1996_v35 = vpop.f32.mrb[15].mxu0  ;;  %v1998_v36 = vpop.f32.mrb[15].mxu1  ;;  %v321_v61 = vld [vmem:[#allocation2 + $0xc0] sm:$0xff]  ;;  %v686_v20 = vadd.f32 %v1910_v12, %v318_v42 }
 0x103   : > { %v1987_v22 = vpop.eup %1603  ;;  %1621 = vpow2.f32 %v912_v19  ;;  %v843_v40 = vsub.f32 0.0, %v811_v24  ;;  %v876_v46 = vmul.f32 1.442695, %v840_v23  ;;  %v809_v16 = vand.u32 2147483647, %v2007_v47  ;;  %v308_v17 = vld [vmem:[#allocation2 + $0x58] sm:$0xff] }
 0x104   : > { %v1993_v29 = vpop.eup %1605  ;;  %v934_v30 = vadd.f32 1.0, %v1987_v22  ;;  %v859_v41 = vsub.f32 0.0, %v827_v26  ;;  %v908_v57 = vmul.f32 1.442695, %v856_v34  ;;  %v324_v23 = vld [vmem:[#allocation2 + $0xd8] sm:$0xff]  ;;  %v673_v34 = vadd.f32 %v1937_v33, %v305_v52  ;;  %719 = vst.msk [vmem:[#allocation2 + $0xa8] sm:$0xff] %vm264_vm2, %v686_v20 }
 0x105   : > { %v2000_v38 = vpop.eup %1607  ;;  %v950_v39 = vadd.f32 1.0, %v1993_v29  ;;  %v2012_v60 = vmul.f32 1.442695, %v843_v40  ;;  %v841_v26 = vsub.f32 0.0, %v809_v16  ;;  %v322_v40 = vld [vmem:[#allocation2 + $0xc8] sm:$0xff]  ;;  %vm1014_vm5 = vcmp.ge.f32.partialorder %v1903_v6, 0.0 }
 0x106   : > { %v2003_v43 = vpop.eup %1609  ;;  %1623 = vrcp.f32 %v934_v30  ;;  %v932_v44 = vadd.f32 1.0, %v2000_v38  ;;  %v2017_v8 = vmul.f32 1.442695, %v859_v41  ;;  %v691_v30 = vadd.f32 %v1935_v32, %v323_v50  ;;  %v311_v41 = vld [vmem:[#allocation2 + $0x70] sm:$0xff]  ;;  %708 = vst.msk [vmem:[#allocation2 + $0x50] sm:$0xff] %vm264_vm2, %v675_v21  ;;  %v309_v33 = vld [vmem:[#allocation2 + $0x60] sm:$0xff] }
 0x107   : > { %v2009_v55 = vpop.eup %1611  ;;  %1625 = vrcp.f32 %v950_v39  ;;  %v948_v56 = vadd.f32 1.0, %v2003_v43  ;;  %v306_v39 = vld [vmem:[#allocation2 + $0x48] sm:$0xff]  ;;  %v689_v27 = vadd.f32 %v1951_v53, %v321_v61  ;;  %v676_v32 = vadd.f32 %v1953_v54, %v308_v17  ;;  %v327_v42 = vld [vmem:[#allocation2 + $0xf0] sm:$0xff]  ;;  %706 = vst.msk [vmem:[#allocation2 + $0x40] sm:$0xff] %vm264_vm2, %v673_v34  ;;  %v328_v16 = vld [vmem:[#allocation2 + $0xf8] sm:$0xff] }
 0x108   : > { %v2014_v0 = vpop.eup %1613  ;;  %1627 = vrcp.f32 %v932_v44  ;;  %v935_v1 = vadd.f32 1.0, %v2009_v55  ;;  %vm996_vm6 = vcmp.ge.f32.partialorder %v1906_v7, 0.0  ;;  %v2038_v50 = vmul.f32 1.442695, %v841_v26  ;;  %724 = vst.msk [vmem:[#allocation2 + $0xd0] sm:$0xff] %vm264_vm2, %v691_v30  ;;  %v326_v17 = vld [vmem:[#allocation2 + $0xe8] sm:$0xff] }
 0x109   : > { %1629 = vrcp.f32 %v948_v56  ;;  %v951_v19 = vadd.f32 1.0, %v2014_v0  ;;  %v2023_v24 = vpop.eup %1615  ;;  %v692_v52 = vadd.f32 %v1956_v58, %v324_v23  ;;  %v325_v56 = vld [vmem:[#allocation2 + $0xe0] sm:$0xff]  ;;  %vm1012_vm8 = vcmp.ge.f32.partialorder %v1914_v14, 0.0  ;;  %722 = vst.msk [vmem:[#allocation2 + $0xc0] sm:$0xff] %vm264_vm2, %v689_v27  ;;  %709 = vst.msk [vmem:[#allocation2 + $0x58] sm:$0xff] %vm264_vm2, %v676_v32  ;;  %v310_v58 = vld [vmem:[#allocation2 + $0x68] sm:$0xff] }
 0x10a   : > { %1631 = vrcp.f32 %v935_v1  ;;  %v2028_v44 = vpop.eup %1617  ;;  %v933_v12 = vadd.f32 1.0, %v2023_v24  ;;  %v312_v1 = vld [vmem:[#allocation2 + $0x78] sm:$0xff]  ;;  %v674_v54 = vadd.f32 %v1958_v59, %v306_v39  ;;  %v679_v61 = vadd.f32 %v1969_v4, %v311_v41 }
 0x10b   : > { %1633 = vrcp.f32 %v951_v19  ;;  %v949_v48 = vadd.f32 1.0, %v2028_v44  ;;  %725 = vst.msk [vmem:[#allocation2 + $0xd8] sm:$0xff] %vm264_vm2, %v692_v52  ;;  %v695_v21 = vadd.f32 %v1971_v5, %v327_v42  ;;  %v677_v23 = vadd.f32 %v1979_v11, %v309_v33 }
 0x10c   : > { %1635 = vpow2.f32 %v876_v46  ;;  %v2043_v53 = vpop.eup %1619  ;;  %v690_v46 = vadd.f32 %v1961_v62, %v322_v40  ;;  %707 = vst.msk [vmem:[#allocation2 + $0x48] sm:$0xff] %vm264_vm2, %v674_v54  ;;  %712 = vst.msk [vmem:[#allocation2 + $0x70] sm:$0xff] %vm264_vm2, %v679_v61  ;;  %v693_v62 = vadd.f32 %v1981_v13, %v325_v56  ;;  %v680_v4 = vadd.f32 %v1984_v18, %v312_v1 }
 0x10d   : > { %1637 = vrcp.f32 %v933_v12  ;;  %v2051_v19 = vpop.eup %1621  ;;  %v938_v20 = vadd.f32 1.0, %v2043_v53  ;;  %728 = vst.msk [vmem:[#allocation2 + $0xf0] sm:$0xff] %vm264_vm2, %v695_v21  ;;  %710 = vst.msk [vmem:[#allocation2 + $0x60] sm:$0xff] %vm264_vm2, %v677_v23  ;;  %v696_v5 = vadd.f32 %v1991_v28, %v328_v16  ;;  %v678_v11 = vadd.f32 %v1996_v35, %v310_v58  ;;  %v754_v28 = vld [vmem:[#allocation2 + $0xa8] sm:$0xff] }
 0x10e   : > { %1639 = vrcp.f32 %v949_v48  ;;  %v954_v59 = vadd.f32 1.0, %v2051_v19  ;;  %723 = vst.msk [vmem:[#allocation2 + $0xc8] sm:$0xff] %vm264_vm2, %v690_v46  ;;  %vm999_vm9 = vcmp.ge.f32.partialorder %v1917_v15, 0.0  ;;  %vm1015_vm10 = vcmp.ge.f32.partialorder %v1928_v25, 0.0  ;;  %726 = vst.msk [vmem:[#allocation2 + $0xe0] sm:$0xff] %vm264_vm2, %v693_v62 }
 0x10f   : > { %1641 = vpow2.f32 %v908_v57  ;;  %v694_v57 = vadd.f32 %v1998_v36, %v326_v17  ;;  %713 = vst.msk [vmem:[#allocation2 + $0x78] sm:$0xff] %vm264_vm2, %v680_v4  ;;  %vm997_vm11 = vcmp.ge.f32.partialorder %v1933_v31, 0.0  ;;  %vm1013_vm12 = vcmp.ge.f32.partialorder %v1941_v37, 0.0  ;;  %729 = vst.msk [vmem:[#allocation2 + $0xf8] sm:$0xff] %vm264_vm2, %v696_v5 }
 0x110   : > { %v1624_v26 = vpop.eup %1623  ;;  %1643 = vrcp.f32 %v938_v20  ;;  %711 = vst.msk [vmem:[#allocation2 + $0x68] sm:$0xff] %vm264_vm2, %v678_v11  ;;  %v2085_v36 = vadd.f32 %v1896_v49, %v754_v28  ;;  %vm1002_vm13 = vcmp.ge.f32.partialorder %v1946_v45, 0.0  ;;  %vm1018_vm14 = vcmp.ge.f32.partialorder %v1949_v51, 0.0  ;;  %v743_v11 = vld [vmem:[#allocation2 + $0x50] sm:$0xff] }
 0x111   : > { %v1626_v30 = vpop.eup %1625  ;;  %v1030_v34 = vmul.f32 %v1624_v26, %v1987_v22  ;;  %1645 = vrcp.f32 %v954_v59  ;;  %727 = vst.msk [vmem:[#allocation2 + $0xe8] sm:$0xff] %vm264_vm2, %v694_v57  ;;  %vm1000_vm15 = vcmp.ge.f32.partialorder %v1964_v2, 0.0  ;;  %vm1016_vm0 = vcmp.ge.f32.partialorder %v1967_v3, 0.0 }
 0x112   : > { %v1628_v13 = vpop.eup %1627  ;;  %v1046_v18 = vmul.f32 %v1626_v30, %v1993_v29  ;;  %1647 = vpow2.f32 %v2012_v60  ;;  %vm1003_vm1 = vcmp.ge.f32.partialorder %v1974_v9, 0.0  ;;  %vm1019_vm2 = vcmp.ge.f32.partialorder %v1977_v10, 0.0 }
 0x113   : > { %v1630_v22 = vpop.eup %1629  ;;  %v1062_v35 = vsel %vm998_vm4, %v1624_v26, %v1030_v34  ;;  %v1028_v29 = vmul.f32 %v1628_v13, %v2000_v38  ;;  %1649 = vpow2.f32 %v2017_v8  ;;  %vm1001_vm3 = vcmp.ge.f32.partialorder %v2007_v47, 0.0 }
 0x114   : > { %v1632_v60 = vpop.eup %1631  ;;  %v1094_v39 = vmul.f32 %v1062_v35, %v1899_v63  ;;  %v1078_v40 = vsel %vm1014_vm5, %v1626_v30, %v1046_v18  ;;  %v1044_v41 = vmul.f32 %v1630_v22, %v2003_v43  ;;  %1651 = vpow2.f32 %v2038_v50 }
 0x115   : > { %v1634_v12 = vpop.eup %1633  ;;  %v1110_v38 = vmul.f32 %v1078_v40, %v1903_v6  ;;  %v1060_v63 = vsel %vm996_vm6, %v1628_v13, %v1028_v29  ;;  %v1031_v8 = vmul.f32 %v1632_v60, %v2009_v55  ;;  %v825_v43 = vand.u32 2147483647, %v2085_v36  ;;  %v741_v13 = vld [vmem:[#allocation2 + $0x40] sm:$0xff] }
 0x116   : > { %v2105_v27 = vpop.eup %1635  ;;  %v1477_v32 = vpack.c.bf16 %v1094_v39, %v1094_v39  ;;  %v1092_v42 = vmul.f32 %v1060_v63, %v1906_v7  ;;  %v1076_v33 = vsel %vm1012_vm8, %v1630_v22, %v1044_v41  ;;  %v1047_v48 = vmul.f32 %v1634_v12, %v2014_v0 }
 0x117   : > { %v1638_v50 = vpop.eup %1637  ;;  %v1493_v6 = vpack.c.bf16 %v1110_v38, %v1110_v38  ;;  %v1108_v52 = vmul.f32 %v1076_v33, %v1914_v14  ;;  %v1063_v55 = vsel %vm999_vm9, %v1632_v60, %v1031_v8  ;;  %v936_v56 = vadd.f32 1.0, %v2105_v27  ;;  %v744_v38 = vld [vmem:[#allocation2 + $0x58] sm:$0xff] }
 0x118   : > { %v1640_v1 = vpop.eup %1639  ;;  %1255 = vst.msk [vmem:[%s2098_s28 + $0x8] sm:$0xf] %vm1252_vm7, %v1477_v32  ;;  %v1475_v54 = vpack.c.bf16 %v1092_v42, %v1092_v42  ;;  %v1095_v7 = vmul.f32 %v1063_v55, %v1917_v15  ;;  %v1079_v0 = vsel %vm1015_vm10, %v1634_v12, %v1047_v48  ;;  %v1029_v46 = vmul.f32 %v1638_v50, %v2023_v24  ;;  %v757_v12 = vld [vmem:[#allocation2 + $0xc0] sm:$0xff]  ;;  %v760_v8 = vld [vmem:[#allocation2 + $0xd8] sm:$0xff] }
 0x119   : > { %v2121_v61 = vpop.eup %1641  ;;  %1271 = vst.msk [vmem:[%s2098_s28 + $0x48] sm:$0xf] %vm1252_vm7, %v1493_v6  ;;  %v1491_v14 = vpack.c.bf16 %v1108_v52, %v1108_v52  ;;  %v1111_v16 = vmul.f32 %v1079_v0, %v1928_v25  ;;  %v1045_v58 = vmul.f32 %v1640_v1, %v2028_v44  ;;  %1653 = vrcp.f32 %v936_v56 }
 0x11a   : > { %v1644_v17 = vpop.eup %1643  ;;  %1253 = vst.msk [vmem:[%s2098_s28] sm:$0xf] %vm1252_vm7, %v1475_v54  ;;  %v1478_v15 = vpack.c.bf16 %v1095_v7, %v1095_v7  ;;  %v1061_v20 = vsel %vm997_vm11, %v1638_v50, %v1029_v46  ;;  %v952_v24 = vadd.f32 1.0, %v2121_v61  ;;  %v857_v21 = vsub.f32 0.0, %v825_v43 }
 0x11b   : > { %v1646_v23 = vpop.eup %1645  ;;  %1269 = vst.msk [vmem:[%s2098_s28 + $0x40] sm:$0xf] %vm1252_vm7, %v1491_v14  ;;  %v1494_v59 = vpack.c.bf16 %v1111_v16, %v1111_v16  ;;  %v1093_v25 = vmul.f32 %v1061_v20, %v1933_v31  ;;  %v1077_v44 = vsel %vm1013_vm12, %v1640_v1, %v1045_v58  ;;  %v1034_v62 = vmul.f32 %v1644_v17, %v2043_v53 }
 0x11c   : > { %v2138_v4 = vpop.eup %1647  ;;  %1256 = vst.msk [vmem:[%s2098_s28 + $0xc] sm:$0xf] %vm1252_vm7, %v1478_v15  ;;  %v1109_v26 = vmul.f32 %v1077_v44, %v1941_v37  ;;  %v1050_v5 = vmul.f32 %v1646_v23, %v2051_v19  ;;  %1655 = vrcp.f32 %v952_v24  ;;  %v910_v34 = vmul.f32 1.442695, %v857_v21  ;;  %v759_v37 = vld [vmem:[#allocation2 + $0xd0] sm:$0xff]  ;;  %v742_v24 = vld [vmem:[#allocation2 + $0x48] sm:$0xff] }
 0x11d   : > { %v2145_v57 = vpop.eup %1649  ;;  %1272 = vst.msk [vmem:[%s2098_s28 + $0x4c] sm:$0xf] %vm1252_vm7, %v1494_v59  ;;  %v1476_v31 = vpack.c.bf16 %v1093_v25, %v1093_v25  ;;  %v1066_v53 = vsel %vm1002_vm13, %v1644_v17, %v1034_v62  ;;  %v939_v30 = vadd.f32 1.0, %v2138_v4  ;;  %v2161_v39 = vadd.f32 %v1896_v49, %v743_v11  ;;  %v758_v21 = vld [vmem:[#allocation2 + $0xc8] sm:$0xff] }
 0x11e   : > { %v2152_v18 = vpop.eup %1651  ;;  %v1492_v19 = vpack.c.bf16 %v1109_v26, %v1109_v26  ;;  %v1098_v28 = vmul.f32 %v1066_v53, %v1946_v45  ;;  %v1082_v22 = vsel %vm1018_vm14, %v1646_v23, %v1050_v5  ;;  %v955_v35 = vadd.f32 1.0, %v2145_v57 }
 0x11f   : > { %1254 = vst.msk [vmem:[%s2098_s28 + $0x4] sm:$0xf] %vm1252_vm7, %v1476_v31  ;;  %v1114_v29 = vmul.f32 %v1082_v22, %v1949_v51  ;;  %1657 = vrcp.f32 %v939_v30  ;;  %v937_v60 = vadd.f32 1.0, %v2152_v18  ;;  %v2166_v45 = vadd.f32 %v1896_v49, %v759_v37 }
 0x120   : > { %1270 = vst.msk [vmem:[%s2098_s28 + $0x44] sm:$0xf] %vm1252_vm7, %v1492_v19  ;;  %v1481_v40 = vpack.c.bf16 %v1098_v28, %v1098_v28  ;;  %1659 = vrcp.f32 %v955_v35  ;;  %v2169_v41 = vadd.f32 %v1896_v49, %v741_v13  ;;  %v814_v63 = vand.u32 2147483647, %v2161_v39 }
 0x121   : > { %v1497_v51 = vpack.c.bf16 %v1114_v29, %v1114_v29  ;;  %1661 = vrcp.f32 %v937_v60  ;;  %v830_v43 = vand.u32 2147483647, %v2166_v45  ;;  %v2181_v48 = vadd.f32 %v1896_v49, %v757_v12  ;;  %v763_v60 = vld [vmem:[#allocation2 + $0xf0] sm:$0xff] }
 0x122   : > { %1259 = vst.msk [vmem:[%s2098_s28 + $0x18] sm:$0xf] %vm1252_vm7, %v1481_v40  ;;  %1663 = vpow2.f32 %v910_v34  ;;  %v812_v32 = vand.u32 2147483647, %v2169_v41  ;;  %v846_v33 = vsub.f32 0.0, %v814_v63  ;;  %v2184_v50 = vadd.f32 %v1896_v49, %v744_v38  ;;  %v745_v38 = vld [vmem:[#allocation2 + $0x60] sm:$0xff] }
 0x123   : > { %v1654_v42 = vpop.eup %1653  ;;  %1275 = vst.msk [vmem:[%s2098_s28 + $0x58] sm:$0xf] %vm1252_vm7, %v1497_v51  ;;  %v862_v52 = vsub.f32 0.0, %v830_v43  ;;  %v2188_v56 = vadd.f32 %v1896_v49, %v760_v8  ;;  %v828_v54 = vand.u32 2147483647, %v2181_v48  ;;  %v2208_v53 = vadd.f32 %v1896_v49, %v742_v24  ;;  %v761_v51 = vld [vmem:[#allocation2 + $0xe0] sm:$0xff] }
 0x124   : > { %v1032_v6 = vmul.f32 %v1654_v42, %v2105_v27  ;;  %v844_v55 = vsub.f32 0.0, %v812_v32  ;;  %v888_v1 = vmul.f32 1.442695, %v846_v33  ;;  %v815_v27 = vand.u32 2147483647, %v2184_v50 }
 0x125   : > { %v920_v46 = vmul.f32 1.442695, %v862_v52  ;;  %v860_v17 = vsub.f32 0.0, %v828_v54  ;;  %v831_v20 = vand.u32 2147483647, %v2188_v56  ;;  %v2211_v30 = vadd.f32 %v1896_v49, %v758_v21 }
 0x126   : > { %v1656_v7 = vpop.eup %1655  ;;  %v1064_v0 = vsel %vm1000_vm15, %v1654_v42, %v1032_v6  ;;  %v884_v14 = vmul.f32 1.442695, %v844_v55  ;;  %1665 = vpow2.f32 %v888_v1  ;;  %v847_v15 = vsub.f32 0.0, %v815_v27 }
 0x127   : > { %v1096_v16 = vmul.f32 %v1064_v0, %v1964_v2  ;;  %v1048_v58 = vmul.f32 %v1656_v7, %v2121_v61  ;;  %1667 = vpow2.f32 %v920_v46  ;;  %v916_v2 = vmul.f32 1.442695, %v860_v17 }
 0x128   : > { %1669 = vpow2.f32 %v884_v14  ;;  %v890_v26 = vmul.f32 1.442695, %v847_v15  ;;  %v863_v5 = vsub.f32 0.0, %v831_v20  ;;  %v813_v29 = vand.u32 2147483647, %v2208_v53 }
 0x129   : > { %v1658_v23 = vpop.eup %1657  ;;  %v1479_v59 = vpack.c.bf16 %v1096_v16, %v1096_v16  ;;  %v1080_v25 = vsel %vm1016_vm0, %v1656_v7, %v1048_v58  ;;  %1671 = vpow2.f32 %v916_v2  ;;  %v829_v12 = vand.u32 2147483647, %v2211_v30 }
 0x12a   : > { %v1660_v44 = vpop.eup %1659  ;;  %v1112_v61 = vmul.f32 %v1080_v25, %v1967_v3  ;;  %v1035_v62 = vmul.f32 %v1658_v23, %v2138_v4  ;;  %1673 = vpow2.f32 %v890_v26  ;;  %v922_v28 = vmul.f32 1.442695, %v863_v5 }
 0x12b   : > { %v1662_v11 = vpop.eup %1661  ;;  %1257 = vst.msk [vmem:[%s2098_s28 + $0x10] sm:$0xf] %vm1252_vm7, %v1479_v59  ;;  %v1051_v31 = vmul.f32 %v1660_v44, %v2145_v57  ;;  %v861_v32 = vsub.f32 0.0, %v829_v12  ;;  %v2246_v52 = vadd.f32 %v1896_v49, %v745_v38  ;;  %v2249_v55 = vadd.f32 %v1896_v49, %v761_v51  ;;  %v764_v59 = vld [vmem:[#allocation2 + $0xf8] sm:$0xff] }
 0x12c   : > { %v2213_v34 = vpop.eup %1663  ;;  %v1495_v3 = vpack.c.bf16 %v1112_v61, %v1112_v61  ;;  %v1067_v4 = vsel %vm1003_vm1, %v1658_v23, %v1035_v62  ;;  %v1033_v37 = vmul.f32 %v1662_v11, %v2152_v18  ;;  %v747_v18 = vld [vmem:[#allocation2 + $0x70] sm:$0xff]  ;;  %vm1017_vm4 = vcmp.ge.f32.partialorder %v2085_v36, 0.0  ;;  %v748_v23 = vld [vmem:[#allocation2 + $0x78] sm:$0xff]  ;;  %v746_v61 = vld [vmem:[#allocation2 + $0x68] sm:$0xff] }
 0x12d   : > { %v1099_v13 = vmul.f32 %v1067_v4, %v1974_v9  ;;  %v1083_v57 = vsel %vm1019_vm2, %v1660_v44, %v1051_v31  ;;  %v953_v19 = vadd.f32 1.0, %v2213_v34  ;;  %v2235_v42 = vadd.f32 %v1896_v49, %v747_v18 }
 0x12e   : > { %1273 = vst.msk [vmem:[%s2098_s28 + $0x50] sm:$0xf] %vm1252_vm7, %v1495_v3  ;;  %v1115_v22 = vmul.f32 %v1083_v57, %v1977_v10  ;;  %v1065_v35 = vsel %vm1001_vm3, %v1662_v11, %v1033_v37  ;;  %v845_v10 = vsub.f32 0.0, %v813_v29  ;;  %v918_v16 = vmul.f32 1.442695, %v861_v32 }
 0x12f   : > { %v1482_v40 = vpack.c.bf16 %v1099_v13, %v1099_v13  ;;  %v1097_v9 = vmul.f32 %v1065_v35, %v2007_v47  ;;  %1675 = vrcp.f32 %v953_v19  ;;  %v2238_v47 = vadd.f32 %v1896_v49, %v763_v60 }
 0x130   : > { %v1498_v63 = vpack.c.bf16 %v1115_v22, %v1115_v22  ;;  %1677 = vpow2.f32 %v922_v28  ;;  %v2230_v8 = vpop.eup %1665  ;;  %v886_v7 = vmul.f32 1.442695, %v845_v10  ;;  %v818_v0 = vand.u32 2147483647, %v2235_v42  ;;  %v762_v22 = vld [vmem:[#allocation2 + $0xe8] sm:$0xff] }
 0x131   : > { %1260 = vst.msk [vmem:[%s2098_s28 + $0x1c] sm:$0xf] %vm1252_vm7, %v1482_v40  ;;  %v1480_v43 = vpack.c.bf16 %v1097_v9, %v1097_v9  ;;  %v2240_v33 = vpop.eup %1667  ;;  %v942_v6 = vadd.f32 1.0, %v2230_v8  ;;  %v834_v14 = vand.u32 2147483647, %v2238_v47  ;;  %vm1006_vm5 = vcmp.ge.f32.partialorder %v2161_v39, 0.0 }
 0x132   : > { %1276 = vst.msk [vmem:[%s2098_s28 + $0x5c] sm:$0xf] %vm1252_vm7, %v1498_v63  ;;  %v2251_v1 = vpop.eup %1669  ;;  %v958_v54 = vadd.f32 1.0, %v2240_v33  ;;  %v850_v58 = vsub.f32 0.0, %v818_v0  ;;  %v816_v17 = vand.u32 2147483647, %v2246_v52  ;;  %v2271_v11 = vadd.f32 %v1896_v49, %v748_v23 }
 0x133   : > { %1258 = vst.msk [vmem:[%s2098_s28 + $0x14] sm:$0xf] %vm1252_vm7, %v1480_v43  ;;  %1679 = vrcp.f32 %v942_v6  ;;  %v940_v46 = vadd.f32 1.0, %v2251_v1  ;;  %v2260_v27 = vpop.eup %1671  ;;  %v866_v24 = vsub.f32 0.0, %v834_v14  ;;  %v832_v21 = vand.u32 2147483647, %v2249_v55 }
 0x134   : > { %1681 = vrcp.f32 %v958_v54  ;;  %v2263_v15 = vpop.eup %1673  ;;  %v956_v20 = vadd.f32 1.0, %v2260_v27  ;;  %v896_v2 = vmul.f32 1.442695, %v850_v58  ;;  %v848_v44 = vsub.f32 0.0, %v816_v17 }
 0x135   : > { %1683 = vrcp.f32 %v940_v46  ;;  %v943_v25 = vadd.f32 1.0, %v2263_v15  ;;  %v928_v62 = vmul.f32 1.442695, %v866_v24  ;;  %v864_v26 = vsub.f32 0.0, %v832_v21 }
 0x136   : > { %1685 = vpow2.f32 %v886_v7  ;;  %vm1022_vm6 = vcmp.ge.f32.partialorder %v2166_v45, 0.0  ;;  %v2274_v31 = vadd.f32 %v1896_v49, %v764_v59  ;;  %v892_v37 = vmul.f32 1.442695, %v848_v44 }
 0x137   : > { %1687 = vrcp.f32 %v956_v20  ;;  %v2280_v13 = vadd.f32 %v1896_v49, %v746_v61  ;;  %v924_v19 = vmul.f32 1.442695, %v864_v26  ;;  %v819_v28 = vand.u32 2147483647, %v2271_v11 }
 0x138   : > { %1689 = vrcp.f32 %v943_v25  ;;  %vm1004_vm8 = vcmp.ge.f32.partialorder %v2169_v41, 0.0  ;;  %vm1020_vm9 = vcmp.ge.f32.partialorder %v2181_v48, 0.0  ;;  %v2292_v12 = vadd.f32 %v1896_v49, %v762_v22 }
 0x139   : > { %v1676_v5 = vpop.eup %1675  ;;  %1691 = vpow2.f32 %v918_v16  ;;  %v851_v18 = vsub.f32 0.0, %v819_v28  ;;  %v817_v60 = vand.u32 2147483647, %v2280_v13  ;;  %vm1007_vm10 = vcmp.ge.f32.partialorder %v2184_v50, 0.0 }
 0x13a   : > { %v2276_v3 = vpop.eup %1677  ;;  %v1049_v4 = vmul.f32 %v1676_v5, %v2213_v34  ;;  %1693 = vpow2.f32 %v896_v2  ;;  %v835_v34 = vand.u32 2147483647, %v2274_v31  ;;  %vm1023_vm11 = vcmp.ge.f32.partialorder %v2188_v56, 0.0 }
 0x13b   : > { %v959_v57 = vadd.f32 1.0, %v2276_v3  ;;  %1695 = vpow2.f32 %v928_v62  ;;  %v898_v10 = vmul.f32 1.442695, %v851_v18  ;;  %v849_v6 = vsub.f32 0.0, %v817_v60 }
 0x13c   : > { %v1081_v35 = vsel %vm1017_vm4, %v1676_v5, %v1049_v4  ;;  %v867_v9 = vsub.f32 0.0, %v835_v34  ;;  %vm1005_vm12 = vcmp.ge.f32.partialorder %v2208_v53, 0.0  ;;  %vm1021_vm13 = vcmp.ge.f32.partialorder %v2211_v30, 0.0 }
 0x13d   : > { %v1113_v29 = vmul.f32 %v1081_v35, %v2085_v36  ;;  %1697 = vrcp.f32 %v959_v57  ;;  %v1680_v40 = vpop.eup %1679  ;;  %v894_v20 = vmul.f32 1.442695, %v849_v6  ;;  %vm1010_vm14 = vcmp.ge.f32.partialorder %v2235_v42, 0.0 }
 0x13e   : > { %1699 = vpow2.f32 %v892_v37  ;;  %v1682_v38 = vpop.eup %1681  ;;  %v1038_v63 = vmul.f32 %v1680_v40, %v2230_v8  ;;  %v930_v32 = vmul.f32 1.442695, %v867_v9  ;;  %v833_v8 = vand.u32 2147483647, %v2292_v12 }
 0x13f   : > { %v1496_v51 = vpack.c.bf16 %v1113_v29, %v1113_v29  ;;  %1701 = vpow2.f32 %v924_v19  ;;  %v1684_v36 = vpop.eup %1683  ;;  %v1054_v43 = vmul.f32 %v1682_v38, %v2240_v33  ;;  %vm1026_vm15 = vcmp.ge.f32.partialorder %v2238_v47, 0.0 }
 0x140   : > { %v2297_v54 = vpop.eup %1685  ;;  %v1070_v49 = vsel %vm1006_vm5, %v1680_v40, %v1038_v63  ;;  %v1036_v7 = vmul.f32 %v1684_v36, %v2251_v1  ;;  %1703 = vpow2.f32 %v898_v10  ;;  %v865_v4 = vsub.f32 0.0, %v833_v8 }
 0x141   : > { %1274 = vst.msk [vmem:[%s2098_s28 + $0x54] sm:$0xf] %vm1252_vm7, %v1496_v51  ;;  %v1688_v0 = vpop.eup %1687  ;;  %v1102_v46 = vmul.f32 %v1070_v49, %v2161_v39  ;;  %v1086_v33 = vsel %vm1022_vm6, %v1682_v38, %v1054_v43  ;;  %v941_v14 = vadd.f32 1.0, %v2297_v54  ;;  %1705 = vpow2.f32 %v930_v32 }
 0x142   : > { %v1690_v16 = vpop.eup %1689  ;;  %v1118_v58 = vmul.f32 %v1086_v33, %v2166_v45  ;;  %v1068_v17 = vsel %vm1004_vm8, %v1684_v36, %v1036_v7  ;;  %v1052_v1 = vmul.f32 %v1688_v0, %v2260_v27  ;;  %v926_v35 = vmul.f32 1.442695, %v865_v4 }
 0x143   : > { %v1692_v24 = vpop.eup %1691  ;;  %v1485_v21 = vpack.c.bf16 %v1102_v46, %v1102_v46  ;;  %v1100_v39 = vmul.f32 %v1068_v17, %v2169_v41  ;;  %v1039_v23 = vmul.f32 %v1690_v16, %v2263_v15  ;;  %1707 = vrcp.f32 %v941_v14 }
 0x144   : > { %v1694_v59 = vpop.eup %1693  ;;  %v1501_v25 = vpack.c.bf16 %v1118_v58, %v1118_v58  ;;  %v1084_v2 = vsel %vm1020_vm9, %v1688_v0, %v1052_v1  ;;  %v957_v45 = vadd.f32 1.0, %v1692_v24  ;;  %1709 = vpow2.f32 %v894_v20 }
 0x145   : > { %v1696_v44 = vpop.eup %1695  ;;  %1263 = vst.msk [vmem:[%s2098_s28 + $0x28] sm:$0xf] %vm1252_vm7, %v1485_v21  ;;  %v1483_v27 = vpack.c.bf16 %v1100_v39, %v1100_v39  ;;  %v1116_v61 = vmul.f32 %v1084_v2, %v2181_v48  ;;  %v1071_v41 = vsel %vm1007_vm10, %v1690_v16, %v1039_v23  ;;  %v946_v62 = vadd.f32 1.0, %v1694_v59 }
 0x146   : > { %1279 = vst.msk [vmem:[%s2098_s28 + $0x68] sm:$0xf] %vm1252_vm7, %v1501_v25  ;;  %v1103_v26 = vmul.f32 %v1071_v41, %v2184_v50  ;;  %1711 = vrcp.f32 %v957_v45  ;;  %v962_v5 = vadd.f32 1.0, %v1696_v44  ;;  %vm1008_vm0 = vcmp.ge.f32.partialorder %v2246_v52, 0.0 }
 0x147   : > { %v1698_v15 = vpop.eup %1697  ;;  %1261 = vst.msk [vmem:[%s2098_s28 + $0x20] sm:$0xf] %vm1252_vm7, %v1483_v27  ;;  %v1499_v57 = vpack.c.bf16 %v1116_v61, %v1116_v61  ;;  %1713 = vrcp.f32 %v946_v62  ;;  %vm1024_vm1 = vcmp.ge.f32.partialorder %v2249_v55, 0.0  ;;  %vm1011_vm2 = vcmp.ge.f32.partialorder %v2271_v11, 0.0 }
 0x148   : > { %v1700_v37 = vpop.eup %1699  ;;  %v1055_v48 = vmul.f32 %v1698_v15, %v2276_v3  ;;  %v1486_v28 = vpack.c.bf16 %v1103_v26, %v1103_v26  ;;  %1715 = vrcp.f32 %v962_v5  ;;  %vm1027_vm3 = vcmp.ge.f32.partialorder %v2274_v31, 0.0 }
 0x149   : > { %v1702_v19 = vpop.eup %1701  ;;  %v944_v22 = vadd.f32 1.0, %v1700_v37  ;;  %1277 = vst.msk [vmem:[%s2098_s28 + $0x60] sm:$0xf] %vm1252_vm7, %v1499_v57  ;;  %vm1009_vm4 = vcmp.ge.f32.partialorder %v2280_v13, 0.0  ;;  %vm1025_vm5 = vcmp.ge.f32.partialorder %v2292_v12, 0.0 }
 0x14a   : > { %v1087_v50 = vsel %vm1023_vm11, %v1698_v15, %v1055_v48  ;;  %v960_v34 = vadd.f32 1.0, %v1702_v19  ;;  %v1704_v29 = vpop.eup %1703  ;;  %1264 = vst.msk [vmem:[%s2098_s28 + $0x2c] sm:$0xf] %vm1252_vm7, %v1486_v28 }
 0x14b   : > { %v1119_v18 = vmul.f32 %v1087_v50, %v2188_v56  ;;  %1717 = vrcp.f32 %v944_v22  ;;  %v1706_v60 = vpop.eup %1705  ;;  %v947_v3 = vadd.f32 1.0, %v1704_v29 }
 0x14c   : > { %1719 = vrcp.f32 %v960_v34  ;;  %v963_v9 = vadd.f32 1.0, %v1706_v60 }
 0x14d   : > { %v1502_v40 = vpack.c.bf16 %v1119_v18, %v1119_v18  ;;  %1721 = vpow2.f32 %v926_v35  ;;  %v1708_v38 = vpop.eup %1707 }
 0x14e   : > { %1723 = vrcp.f32 %v947_v3  ;;  %v1710_v51 = vpop.eup %1709  ;;  %v1037_v63 = vmul.f32 %v1708_v38, %v2297_v54 }
 0x14f   : > { %1280 = vst.msk [vmem:[%s2098_s28 + $0x6c] sm:$0xf] %vm1252_vm7, %v1502_v40  ;;  %1725 = vrcp.f32 %v963_v9  ;;  %v945_v10 = vadd.f32 1.0, %v1710_v51 }
 0x150   : > { %v1712_v36 = vpop.eup %1711  ;;  %v1069_v56 = vsel %vm1005_vm12, %v1708_v38, %v1037_v63 }
 0x151   : > { %v1714_v43 = vpop.eup %1713  ;;  %v1101_v32 = vmul.f32 %v1069_v56, %v2208_v53  ;;  %v1053_v6 = vmul.f32 %v1712_v36, %v1692_v24  ;;  %1727 = vrcp.f32 %v945_v10 }
 0x152   : > { %v1716_v49 = vpop.eup %1715  ;;  %v1042_v7 = vmul.f32 %v1714_v43, %v1694_v59 }
 0x153   : > { %v1484_v8 = vpack.c.bf16 %v1101_v32, %v1101_v32  ;;  %v1085_v0 = vsel %vm1021_vm13, %v1712_v36, %v1053_v6  ;;  %v1058_v54 = vmul.f32 %v1716_v49, %v1696_v44 }
 0x154   : > { %v1117_v33 = vmul.f32 %v1085_v0, %v2211_v30  ;;  %v1074_v14 = vsel %vm1010_vm14, %v1714_v43, %v1042_v7 }
 0x155   : > { %v1718_v46 = vpop.eup %1717  ;;  %1262 = vst.msk [vmem:[%s2098_s28 + $0x24] sm:$0xf] %vm1252_vm7, %v1484_v8  ;;  %v1106_v53 = vmul.f32 %v1074_v14, %v2235_v42  ;;  %v1090_v58 = vsel %vm1026_vm15, %v1716_v49, %v1058_v54 }
 0x156   : > { %v1720_v16 = vpop.eup %1719  ;;  %v1040_v17 = vmul.f32 %v1718_v46, %v1700_v37  ;;  %v1500_v20 = vpack.c.bf16 %v1117_v33, %v1117_v33  ;;  %v1122_v24 = vmul.f32 %v1090_v58, %v2238_v47 }
 0x157   : > { %v1722_v1 = vpop.eup %1721  ;;  %v1056_v21 = vmul.f32 %v1720_v16, %v1702_v19  ;;  %v1489_v39 = vpack.c.bf16 %v1106_v53, %v1106_v53 }
 0x158   : > { %v1724_v30 = vpop.eup %1723  ;;  %v1072_v23 = vsel %vm1008_vm0, %v1718_v46, %v1040_v17  ;;  %v961_v59 = vadd.f32 1.0, %v1722_v1  ;;  %1278 = vst.msk [vmem:[%s2098_s28 + $0x64] sm:$0xf] %vm1252_vm7, %v1500_v20  ;;  %v1505_v42 = vpack.c.bf16 %v1122_v24, %v1122_v24 }
 0x159   : > { %v1726_v25 = vpop.eup %1725  ;;  %v1104_v2 = vmul.f32 %v1072_v23, %v2246_v52  ;;  %v1088_v45 = vsel %vm1024_vm1, %v1720_v16, %v1056_v21  ;;  %v1043_v44 = vmul.f32 %v1724_v30, %v1704_v29  ;;  %1267 = vst.msk [vmem:[%s2098_s28 + $0x38] sm:$0xf] %vm1252_vm7, %v1489_v39 }
 0x15a   : > { %v1120_v47 = vmul.f32 %v1088_v45, %v2249_v55  ;;  %v1059_v27 = vmul.f32 %v1726_v25, %v1706_v60  ;;  %1729 = vrcp.f32 %v961_v59  ;;  %1283 = vst.msk [vmem:[%s2098_s28 + $0x78] sm:$0xf] %vm1252_vm7, %v1505_v42 }
 0x15b   : > { %v1487_v61 = vpack.c.bf16 %v1104_v2, %v1104_v2  ;;  %v1075_v41 = vsel %vm1011_vm2, %v1724_v30, %v1043_v44  ;;  %v1728_v52 = vpop.eup %1727 }
 0x15c   : > { %v1503_v62 = vpack.c.bf16 %v1120_v47, %v1120_v47  ;;  %v1107_v15 = vmul.f32 %v1075_v41, %v2271_v11  ;;  %v1091_v26 = vsel %vm1027_vm3, %v1726_v25, %v1059_v27  ;;  %v1041_v5 = vmul.f32 %v1728_v52, %v1710_v51 }
 0x15d   : > { %1265 = vst.msk [vmem:[%s2098_s28 + $0x30] sm:$0xf] %vm1252_vm7, %v1487_v61  ;;  %v1123_v55 = vmul.f32 %v1091_v26, %v2274_v31 }
 0x15e   : > { %1281 = vst.msk [vmem:[%s2098_s28 + $0x70] sm:$0xf] %vm1252_vm7, %v1503_v62  ;;  %v1490_v4 = vpack.c.bf16 %v1107_v15, %v1107_v15  ;;  %v1073_v57 = vsel %vm1009_vm4, %v1728_v52, %v1041_v5 }
 0x15f   : > { %v1506_v37 = vpack.c.bf16 %v1123_v55, %v1123_v55  ;;  %v1105_v48 = vmul.f32 %v1073_v57, %v2280_v13 }
 0x160   : > { %1268 = vst.msk [vmem:[%s2098_s28 + $0x3c] sm:$0xf] %vm1252_vm7, %v1490_v4 }
 0x161   : > { %1284 = vst.msk [vmem:[%s2098_s28 + $0x7c] sm:$0xf] %vm1252_vm7, %v1506_v37  ;;  %v1488_v11 = vpack.c.bf16 %v1105_v48, %v1105_v48 }
 0x163   : > { %1266 = vst.msk [vmem:[%s2098_s28 + $0x34] sm:$0xf] %vm1252_vm7, %v1488_v11 }
 0x164   : > { %v1730_v19 = vpop.eup %1729 }
 0x165   : > { %v1057_v31 = vmul.f32 %v1730_v19, %v1722_v1 }
 0x167   : > { %v1089_v28 = vsel %vm1025_vm5, %v1730_v19, %v1057_v31 }
 0x168   : > { %v1121_v22 = vmul.f32 %v1089_v28, %v2292_v12 }
 0x16a   : > { %v1504_v35 = vpack.c.bf16 %v1121_v22, %v1121_v22 }
 0x16c   : > { %1282 = vst.msk [vmem:[%s2098_s28 + $0x74] sm:$0xf] %vm1252_vm7, %v1504_v35 }
 0x16d PF: > { %s13_s14 = sadd.s32 1, %s1753_s14   ;;  %s2391_s12 = smov %s1749_s13 }
 0x16e   : > { %p10_p5 = scmp.ge.s32.totalorder %s13_s14, 4   ;;  %s2392_s13 = smov %s2394_s15 }
 0x170   :  { %12 = sbr.rel (!%p10_p5) target bundleno = 2 (0x2), region = 76 }

</bundles_post_ra>
